<compile_context>
chip_gen: v7x
topology: tpu7x:2x2x1
jax: 0.10.0
libtpu: 0.0.40
codegen_flags: <defaults>
</compile_context>

<pallas_src>
from functools import partial

import jax
import jax.numpy as jnp
from jax.experimental import pallas as pl
from jax.experimental.pallas import tpu as pltpu


def linear_kernel(xt_ref, w_ref, b_ref, ot_ref):
    """One lane-dense batch tile of y^T = W @ x^T + b.

    xt_ref: (K, tile)  VMEM  -- x transposed, batch on the 128-wide lane axis
    w_ref : (O, K)     SMEM  -- scalar weights
    b_ref : (O,)       SMEM  -- scalar bias
    ot_ref: (O, tile)  VMEM  -- y transposed
    """
    k = xt_ref.shape[0]
    o = ot_ref.shape[0]
    # Load each input row once; keep them 2-D (1, tile) so they stay lane-dense.
    x_rows = [xt_ref[kk:kk + 1, :].astype(jnp.float32) for kk in range(k)]
    for oo in range(o):
        acc = x_rows[0] * w_ref[oo, 0]                 # f32 accumulation
        for kk in range(1, k):
            acc = acc + x_rows[kk] * w_ref[oo, kk]     # VPU FMA with sreg weight
        ot_ref[oo:oo + 1, :] = (acc + b_ref[oo]).astype(ot_ref.dtype)


def _round_up(v, m):
    return -(-v // m) * m


@partial(jax.jit, static_argnames=("tile_n",))
def linear_forward(x, weight, bias, *, tile_n=32768):
    """Pallas equivalent of nn.Linear: y = x @ weight.T + bias.

    x: (N, in_features), weight: (out_features, in_features), bias: (out_features,)
    """
    n, in_features = x.shape
    out_features = weight.shape[0]

    # --- tile selection (batch columns, lane axis) -------------------------
    tile_cap = max(128, (tile_n // 128) * 128)            # lane-aligned cap
    tile = min(tile_cap, _round_up(pl.cdiv(n, 2), 128))   # >=2 grid steps when n is
    if tile >= n:                                         # large enough (v7x megacore)
        tile = n                                          # single full block otherwise
    grid = (pl.cdiv(n, tile),)

    xt = x.T                                              # (K, N): fuses under jit

    yt = pl.pallas_call(
        linear_kernel,
        out_shape=jax.ShapeDtypeStruct((out_features, n), x.dtype),
        grid=grid,
        in_specs=[
            # x^T tiled over the batch (lane) axis; K rows stay resident per step.
            pl.BlockSpec((in_features, tile), lambda i: (0, i)),
            # Weights / bias: whole arrays resident in SMEM, read as scalars.
            pl.BlockSpec(memory_space=pltpu.MemorySpace.SMEM),
            pl.BlockSpec(memory_space=pltpu.MemorySpace.SMEM),
        ],
        out_specs=pl.BlockSpec((out_features, tile), lambda i: (0, i)),
        compiler_params=pltpu.CompilerParams(
            dimension_semantics=("parallel",),            # v7x: shard steps across 2 TCs
            vmem_limit_bytes=32 * 1024 * 1024,            # safe on v7x's 64 MiB VMEM
        ),
    )(xt, weight, bias)

    return yt.T                                           # (N, O): fuses under jit


if __name__ == "__main__":
    key = jax.random.PRNGKey(0)
    k_x, k_w, k_b, k_x2 = jax.random.split(key, 4)

    in_features, out_features, batch = 3, 2, 8

    # Deterministic parameter init mimicking nn.Linear's U(-1/sqrt(fan_in), 1/sqrt(fan_in))
    bound = 1.0 / jnp.sqrt(jnp.float32(in_features))
    weight = jax.random.uniform(k_w, (out_features, in_features),
                                minval=-bound, maxval=bound, dtype=jnp.float32)
    bias = jax.random.uniform(k_b, (out_features,),
                              minval=-bound, maxval=bound, dtype=jnp.float32)

    # Small test (single full block).
    x = jax.random.normal(k_x, (batch, in_features), dtype=jnp.float32)
    y = linear_forward(x, weight, bias)
    jax.block_until_ready(y)
    y_ref = x @ weight.T + bias
    assert y.shape == (batch, out_features)
    assert jnp.allclose(y, y_ref, atol=1e-5, rtol=1e-5)

    # Moderate test: exercises a 2-step grid (v7x megacore path) with a partial last tile.
    n_big = 2 * 1024 + 8
    x_big = jax.random.normal(k_x2, (n_big, in_features), dtype=jnp.float32)
    y_big = linear_forward(x_big, weight, bias)
    jax.block_until_ready(y_big)
    y_big_ref = x_big @ weight.T + bias
    assert y_big.shape == (n_big, out_features)
    assert jnp.allclose(y_big, y_big_ref, atol=1e-5, rtol=1e-5)

    print("KERNEL_OK")
</pallas_src>

<mosaic_0001>
module attributes {stable_mosaic.version = 11 : i64} {
  func.func @linear_kernel(%arg0: i32, %arg1: memref<3x8xf32, #tpu.memory_space<vmem>>, %arg2: memref<2x3xf32, #tpu.memory_space<smem>>, %arg3: memref<2xf32, #tpu.memory_space<smem>>, %arg4: memref<2x8xf32, #tpu.memory_space<vmem>>) attributes {dimension_semantics = [#tpu.dimension_semantics<parallel>], iteration_bounds = array<i64: 1>, scalar_prefetch = 0 : i64, scratch_operands = 0 : i64, tpu.core_type = #tpu.core_type<tc>, window_params = [{transform_indices = @transform_0, window_bounds = array<i64: 3, 8>}, {transform_indices = @transform_1, window_bounds = array<i64: 2, 3>}, {transform_indices = @transform_2, window_bounds = array<i64: 2>}, {transform_indices = @transform_3, window_bounds = array<i64: 2, 8>}]} {
    %c0 = arith.constant 0 : index
    %c0_0 = arith.constant 0 : index
    %0 = vector.load %arg1[%c0, %c0_0] : memref<3x8xf32, #tpu.memory_space<vmem>>, vector<1x8xf32>
    %c1 = arith.constant 1 : index
    %c0_1 = arith.constant 0 : index
    %1 = vector.load %arg1[%c1, %c0_1] : memref<3x8xf32, #tpu.memory_space<vmem>>, vector<1x8xf32>
    %c2 = arith.constant 2 : index
    %c0_2 = arith.constant 0 : index
    %2 = vector.load %arg1[%c2, %c0_2] : memref<3x8xf32, #tpu.memory_space<vmem>>, vector<1x8xf32>
    %c0_3 = arith.constant 0 : index
    %c0_4 = arith.constant 0 : index
    %3 = memref.load %arg2[%c0_3, %c0_4] : memref<2x3xf32, #tpu.memory_space<smem>>
    %4 = vector.broadcast %3 : f32 to vector<1x8xf32>
    %5 = arith.mulf %0, %4 : vector<1x8xf32>
    %c0_5 = arith.constant 0 : index
    %c1_6 = arith.constant 1 : index
    %6 = memref.load %arg2[%c0_5, %c1_6] : memref<2x3xf32, #tpu.memory_space<smem>>
    %7 = vector.broadcast %6 : f32 to vector<1x8xf32>
    %8 = arith.mulf %1, %7 : vector<1x8xf32>
    %9 = arith.addf %5, %8 : vector<1x8xf32>
    %c0_7 = arith.constant 0 : index
    %c2_8 = arith.constant 2 : index
    %10 = memref.load %arg2[%c0_7, %c2_8] : memref<2x3xf32, #tpu.memory_space<smem>>
    %11 = vector.broadcast %10 : f32 to vector<1x8xf32>
    %12 = arith.mulf %2, %11 : vector<1x8xf32>
    %13 = arith.addf %9, %12 : vector<1x8xf32>
    %c0_9 = arith.constant 0 : index
    %14 = memref.load %arg3[%c0_9] : memref<2xf32, #tpu.memory_space<smem>>
    %15 = vector.broadcast %14 : f32 to vector<1x8xf32>
    %16 = arith.addf %13, %15 : vector<1x8xf32>
    %c0_10 = arith.constant 0 : index
    %c0_11 = arith.constant 0 : index
    %17 = vector.load %arg4[%c0_10, %c0_11] : memref<2x8xf32, #tpu.memory_space<vmem>>, vector<1x8xf32>
    tpu.vector_store %arg4[%c0_10, %c0_11], %16 {strides = array<i32>} : memref<2x8xf32, #tpu.memory_space<vmem>>, vector<1x8xf32>,
    %c1_12 = arith.constant 1 : index
    %c0_13 = arith.constant 0 : index
    %18 = memref.load %arg2[%c1_12, %c0_13] : memref<2x3xf32, #tpu.memory_space<smem>>
    %19 = vector.broadcast %18 : f32 to vector<1x8xf32>
    %20 = arith.mulf %0, %19 : vector<1x8xf32>
    %c1_14 = arith.constant 1 : index
    %c1_15 = arith.constant 1 : index
    %21 = memref.load %arg2[%c1_14, %c1_15] : memref<2x3xf32, #tpu.memory_space<smem>>
    %22 = vector.broadcast %21 : f32 to vector<1x8xf32>
    %23 = arith.mulf %1, %22 : vector<1x8xf32>
    %24 = arith.addf %20, %23 : vector<1x8xf32>
    %c1_16 = arith.constant 1 : index
    %c2_17 = arith.constant 2 : index
    %25 = memref.load %arg2[%c1_16, %c2_17] : memref<2x3xf32, #tpu.memory_space<smem>>
    %26 = vector.broadcast %25 : f32 to vector<1x8xf32>
    %27 = arith.mulf %2, %26 : vector<1x8xf32>
    %28 = arith.addf %24, %27 : vector<1x8xf32>
    %c1_18 = arith.constant 1 : index
    %29 = memref.load %arg3[%c1_18] : memref<2xf32, #tpu.memory_space<smem>>
    %30 = vector.broadcast %29 : f32 to vector<1x8xf32>
    %31 = arith.addf %28, %30 : vector<1x8xf32>
    %c1_19 = arith.constant 1 : index
    %c0_20 = arith.constant 0 : index
    %32 = vector.load %arg4[%c1_19, %c0_20] : memref<2x8xf32, #tpu.memory_space<vmem>>, vector<1x8xf32>
    tpu.vector_store %arg4[%c1_19, %c0_20], %31 {strides = array<i32>} : memref<2x8xf32, #tpu.memory_space<vmem>>, vector<1x8xf32>,
    return
  }
  func.func @transform_0(%arg0: i32) -> (i32, i32) {
    %c0_i32 = arith.constant 0 : i32
    %c0_i32_0 = arith.constant 0 : i32
    return %c0_i32, %arg0 : i32, i32
  }
  func.func @transform_1(%arg0: i32) -> (i32, i32) {
    %c0_i32 = arith.constant 0 : i32
    %c0_i32_0 = arith.constant 0 : i32
    %c0_i32_1 = arith.constant 0 : i32
    return %c0_i32, %c0_i32_0 : i32, i32
  }
  func.func @transform_2(%arg0: i32) -> i32 {
    %c0_i32 = arith.constant 0 : i32
    %c0_i32_0 = arith.constant 0 : i32
    return %c0_i32 : i32
  }
  func.func @transform_3(%arg0: i32) -> (i32, i32) {
    %c0_i32 = arith.constant 0 : i32
    %c0_i32_0 = arith.constant 0 : i32
    return %c0_i32, %arg0 : i32, i32
  }
}

</mosaic_0001>

<bundles_post_ra>
// kernel: linear_forward.1
= control target key start
LH: loop header
LB: loop body
LE: loop exit
PB: predicated region body
PF: predicated region fallthrough
CT: control target
= control target key end

     0   :  { %8 = vsyncpa [#allocation3], 0  ;;  %s243_s0 = inlined_call_operand.hbm [shape: f32[3,8], index: 0, kind: input, shape index: {}]   ;;  %s244_s1 = inlined_call_operand.vmem [shape: f32[2,3], index: 1, kind: input, shape index: {}]   ;;  %s245_s2 = inlined_call_operand.vmem [shape: f32[2], index: 2, kind: input, shape index: {}]   ;;  %s246_s3 = inlined_call_operand.hbm [shape: f32[2,8], index: 3, kind: output, shape index: {}]  }
   0x1   :  { %9 = vsyncpa [#allocation5], 0 }
   0x2   :  { %10 = vsyncpa [#allocation8], 0 }
   0x3   :  { %11 = vsyncpa [#allocation4], 0  ;;  %s28_s14 = sshll.u32 %s244_s1, 4  ;;  %s189_s15 = smov [#allocation2]   ;;  %s29_s14 = int_to_ptr.vmem [resolvable:$true] %s28_s14 }
   0x4   :  { %s18_s16 = sshll.u32 %s189_s15, 4  ;;  %s113_s19 = scalar_lea.hbm %s243_s0, 64  ;;  %s19_s16 = int_to_ptr.vmem [resolvable:$true] %s18_s16 }
   0x5   :  { %p114_p0 = scmp.ne.s32.totalorder %s243_s0, %s113_s19  ;;  %p117_p1 = scmp.lt.u32.totalorder %s113_s19, %s243_s0 }
   0x7   :  { %p119_p2 = pnand %p117_p1, %p114_p0 }
   0x9   :  { %122 = shalt.err (!%p119_p2)
}
   0xa   :  { %s123_s24 = scalar_lea.vmem %s19_s16, 64  ;;  %p128_p4 = scmp.lt.s32.totalorder %s19_s16, %s19_s16 }
   0xb   :  { %p124_p3 = scmp.ne.s32.totalorder %s19_s16, %s123_s24  ;;  %p129_p5 = scmp.lt.s32.totalorder %s123_s24, %s123_s24 }
   0xd   :  { %p130_p6 = por %p129_p5, %p128_p4 }
   0xf   :  { %p131_p7 = pnand %p130_p6, %p124_p3 }
  0x11   :  { %134 = shalt.err (!%p131_p7)
}
  0x12   :  { %21 = dma.hbm_to_vmem [thread:$0]  %s243_s0, 64, %s19_s16, [#allocation3]  }
  0x13   :  { %s135_s26 = scalar_lea.vmem %s29_s14, 32  ;;  %p140_p9 = scmp.lt.s32.totalorder %s29_s14, %s29_s14 }
  0x14   :  { %p136_p8 = scmp.ne.s32.totalorder %s29_s14, %s135_s26  ;;  %p141_p10 = scmp.lt.s32.totalorder %s135_s26, %s135_s26 }
  0x16   :  { %p142_p11 = por %p141_p10, %p140_p9 }
  0x18   :  { %p143_p12 = pnand %p142_p11, %p136_p8 }
  0x1a   :  { %146 = shalt.err (!%p143_p12)
}
  0x1b   :  { %s190_s27 = smov [#allocation6]   ;;  %s38_s30 = sshll.u32 %s245_s2, 4  ;;  %s39_s30 = int_to_ptr.vmem [resolvable:$true] %s38_s30 }
  0x1c   :  { %31 = dma.vmem_to_smem %s29_s14, 32, %s190_s27, [#allocation5]  }
  0x1d   :  { %s147_s4 = scalar_lea.vmem %s39_s30, 16  ;;  %p152_p0 = scmp.lt.s32.totalorder %s39_s30, %s39_s30 }
  0x1e   :  { %p148_p13 = scmp.ne.s32.totalorder %s39_s30, %s147_s4  ;;  %p153_p1 = scmp.lt.s32.totalorder %s147_s4, %s147_s4 }
  0x20   :  { %p154_p2 = por %p153_p1, %p152_p0 }
  0x22   :  { %p155_p3 = pnand %p154_p2, %p148_p13 }
  0x24   :  { %158 = shalt.err (!%p155_p3)
}
  0x25   :  { %s191_s0 = smov [#allocation7]  }
  0x26   :  { %41 = dma.vmem_to_smem %s39_s30, 16, %s191_s0, [#allocation8]  }
  0x27   :  { %181 = dma.done.wait [#allocation3], 64  }
  0x28   :  { %182 = vsyncadd [#allocation3], 4294967232 }
  0x29   :  { %183 = dma.done.wait [#allocation5], 32  }
  0x2a   :  { %184 = vsyncadd [#allocation5], 4294967264 }
  0x2b   :  { %185 = dma.done.wait [#allocation8], 16  }
  0x2c   :  { %186 = vsyncadd [#allocation8], 4294967280 }
  0x2d   :  { %51 = sfence }
  0x2e   :  { %s55_s5 = sld [smem:[#allocation6]]  ;;  %s103_s6 = sld [smem:[#allocation6 + $0x1]]  ;;  %v52_v0 = vld [vmem:[#allocation2] sm:$0x1]  ;;  %v53_v1 = vld [vmem:[#allocation2 + $0x1] sm:$0x1] }
  0x2f   :  { %s104_s2 = sld [smem:[#allocation6 + $0x2]]  ;;  %s66_s7 = sld [smem:[#allocation7]]  ;;  %v54_v2 = vld [vmem:[#allocation2 + $0x2] sm:$0x1]  ;;  %vm69_vm0 = vcmask 57344  }
  0x30   :  { %s105_s8 = sld [smem:[#allocation6 + $0x80]]  ;;  %s106_s9 = sld [smem:[#allocation6 + $0x81]] }
  0x31   :  { %s107_s10 = sld [smem:[#allocation6 + $0x82]]  ;;  %s108_s11 = sld [smem:[#allocation7 + $0x1]] }
  0x32   :  { %s192_s12 = smov [#allocation9]  }
  0x33   :  { %s92_s13 = sshll.u32 %s192_s12, 4  ;;  %s93_s13 = int_to_ptr.vmem [resolvable:$true] %s92_s13 }
  0x34   :  { %v56_v3 = vstv %s55_s5  ;;  %v59_v4 = vstv %s103_s6  ;;  %s159_s14 = scalar_lea.vmem %s93_s13, 32  ;;  %p164_p5 = scmp.lt.s32.totalorder %s93_s13, %s93_s13 }
  0x35   :  { %v57_v5 = vmul.f32 %v56_v3, %v52_v0  ;;  %v60_v6 = vmul.f32 %v59_v4, %v53_v1  ;;  %v63_v7 = vstv %s104_s2  ;;  %v67_v15 = vstv %s66_s7  ;;  %p160_p4 = scmp.ne.s32.totalorder %s93_s13, %s159_s14  ;;  %p165_p6 = scmp.lt.s32.totalorder %s159_s14, %s159_s14 }
  0x36   :  { %v64_v8 = vmul.f32 %v63_v7, %v54_v2  ;;  %v72_v9 = vstv %s105_s8  ;;  %v75_v10 = vstv %s106_s9 }
  0x37   :  { %v61_v11 = vadd.f32 %v60_v6, %v57_v5  ;;  %v73_v12 = vmul.f32 %v72_v9, %v52_v0  ;;  %v76_v13 = vmul.f32 %v75_v10, %v53_v1  ;;  %v79_v14 = vstv %s107_s10  ;;  %p166_p7 = por %p165_p6, %p164_p5 }
  0x38   :  { %v80_v16 = vmul.f32 %v79_v14, %v54_v2  ;;  %v83_v19 = vstv %s108_s11 }
  0x39   :  { %v65_v17 = vadd.f32 %v64_v8, %v61_v11  ;;  %v77_v18 = vadd.f32 %v76_v13, %v73_v12  ;;  %p167_p8 = pnand %p166_p7, %p160_p4 }
  0x3b   :  { %v68_v20 = vadd.f32 %v67_v15, %v65_v17  ;;  %v81_v21 = vadd.f32 %v80_v16, %v77_v18 }
  0x3d   :  { %70 = vst.msk [vmem:[#allocation9] sm:$0x1] %vm69_vm0, %v68_v20  ;;  %v84_v22 = vadd.f32 %v83_v19, %v81_v21 }
  0x3f   :  { %85 = vst.msk [vmem:[#allocation9 + $0x1] sm:$0x1] %vm69_vm0, %v84_v22 }
  0x40   :  { %170 = shalt.err (!%p167_p8)
}
  0x41   :  { %s171_s17 = scalar_lea.hbm %s246_s3, 32 }
  0x42   :  { %p172_p9 = scmp.ne.s32.totalorder %s246_s3, %s171_s17  ;;  %p175_p10 = scmp.lt.u32.totalorder %s171_s17, %s246_s3 }
  0x44   :  { %p177_p11 = pnand %p175_p10, %p172_p9 }
  0x46   :  { %180 = shalt.err (!%p177_p11)
}
  0x47   :  { %95 = dma.vmem_to_hbm [thread:$0]  %s93_s13, 32, %s246_s3, [#allocation4]  }
  0x48   :  { %187 = dma.done.wait [#allocation4], 32  }
  0x49   :  { %188 = vsyncadd [#allocation4], 4294967264 }
  0x4a   :  { %99 = vsyncpa [#allocation3], 1 }
  0x4b   :  { %100 = vsyncpa [#allocation4], 1 }
  0x4c   :  { %101 = vsyncpa [#allocation5], 1 }
  0x4d   :  { %102 = vsyncpa [#allocation8], 1 }

</bundles_post_ra>
